<compile_context>
chip_gen: v6e
topology: v6e:2x2x1
jax: 0.10.0
libtpu: 0.0.40
codegen_flags: <defaults>
</compile_context>

<pallas_src>
import functools

import jax
import jax.numpy as jnp
from jax.experimental import pallas as pl
from jax.experimental.pallas import tpu as pltpu


def _choose_tile(dim: int, max_tile: int, align: int) -> int:
    """Largest divisor of `dim` that is <= max_tile and a multiple of `align`.

    Falls back to `dim` itself (full extent, always legal for BlockSpec) when
    `dim` is already small or no aligned divisor exists.
    """
    if dim <= max_tile:
        return dim
    t = (max_tile // align) * align
    while t >= align:
        if dim % t == 0:
            return t
        t -= align
    return dim


def _gap_dr_kernel(x_ref, w_ref, scale_ref, shift_ref, o_ref, acc_ref):
    # x_ref:     (1, C_in, hw_tile)  spatial tile of one batch element (NCHW layout)
    # w_ref:     (C_out, C_in)       1x1 conv weight
    # scale_ref: (C_out, 1)          folded BN scale * (1/HW)
    # shift_ref: (C_out, 1)          folded BN shift * (1/HW)
    # o_ref:     (1, C_out, 1)       pooled output for this batch element
    # acc_ref:   (C_out, 1) f32      running sum over spatial tiles (VMEM scratch)
    t = pl.program_id(1)

    @pl.when(t == 0)
    def _init():
        acc_ref[...] = jnp.zeros_like(acc_ref)

    x = x_ref[0]                                                       # (C_in, hw_tile)
    y = jnp.dot(w_ref[...], x, preferred_element_type=jnp.float32)    # (C_out, hw_tile)
    y = jnp.maximum(y * scale_ref[...] + shift_ref[...], 0.0)         # BN(eval)+ReLU (1/HW folded)
    acc_ref[...] += jnp.sum(y, axis=1, keepdims=True)                 # (C_out, 1)

    @pl.when(t == pl.num_programs(1) - 1)
    def _finalize():
        o_ref[0] = acc_ref[...].astype(o_ref.dtype)


def _gap_kernel(x_ref, o_ref, acc_ref, *, inv_hw: float):
    # x_ref:   (1, c_tile, hw_tile)   NCHW tile; reduce over the lane (HW) axis
    # o_ref:   (1, c_tile, 1)
    # acc_ref: (c_tile, 1) f32        running sum over spatial tiles
    t = pl.program_id(2)

    @pl.when(t == 0)
    def _init():
        acc_ref[...] = jnp.zeros_like(acc_ref)

    acc_ref[...] += jnp.sum(x_ref[0].astype(jnp.float32), axis=1, keepdims=True)

    @pl.when(t == pl.num_programs(2) - 1)
    def _finalize():
        o_ref[0] = (acc_ref[...] * inv_hw).astype(o_ref.dtype)


class GlobalAvgPool:
    """JAX/Pallas port of rx_connect GlobalAvgPool (forward pass, eval-mode BN)."""

    def __init__(self, input_dim: int = 2048, dim_reduction=None):
        self.dr = dim_reduction
        self.has_dr = (dim_reduction is not None) and (input_dim != dim_reduction)
        self.output_dim = dim_reduction if dim_reduction is not None else input_dim

        if self.has_dr:
            key = jax.random.PRNGKey(42)
            # nn.Conv2d(input_dim, dr, kernel_size=1, bias=False): weight (dr, input_dim, 1, 1)
            bound = 1.0 / float(input_dim) ** 0.5
            self.w = jax.random.uniform(
                key, (self.dr, input_dim), dtype=jnp.float32, minval=-bound, maxval=bound
            )  # (C_out, C_in)

            # nn.BatchNorm2d(dr) default params, eval-mode semantics.
            gamma = jnp.ones((self.dr,), jnp.float32)
            beta = jnp.zeros((self.dr,), jnp.float32)
            running_mean = jnp.zeros((self.dr,), jnp.float32)
            running_var = jnp.ones((self.dr,), jnp.float32)
            eps = 1e-5
            self.scale = gamma / jnp.sqrt(running_var + eps)          # (C_out,)
            self.shift = beta - running_mean * self.scale             # (C_out,)
            # TODO(synk): training-mode BatchNorm (batch statistics) not implemented;
            # eval-mode running stats are used, matching inference semantics.

    def __call__(self, x):
        # x: NCHW.  Merge H,W -> HW (metadata-only reshape, no HBM traffic).
        n, c, h, w = x.shape
        hw = h * w
        x3 = x.reshape(n, c, hw)
        itemsize = jnp.dtype(x.dtype).itemsize

        if self.has_dr:
            c_out = self.output_dim
            # ~4 MiB per x block (x2 double-buffering) keeps well under the
            # 32 MiB scoped-VMEM default on all of v5e/v6e/v7x.
            target_hw = max(128, (4 * 1024 * 1024) // max(1, c * itemsize))
            hw_tile = _choose_tile(hw, target_hw, 128)
            grid = (n, hw // hw_tile)

            inv_hw = 1.0 / float(hw)
            w_mat = self.w.astype(x.dtype)                                  # (C_out, C_in)
            scale = (self.scale * inv_hw).reshape(c_out, 1).astype(jnp.float32)
            shift = (self.shift * inv_hw).reshape(c_out, 1).astype(jnp.float32)

            out = pl.pallas_call(
                _gap_dr_kernel,
                out_shape=jax.ShapeDtypeStruct((n, c_out, 1), x.dtype),
                grid=grid,
                in_specs=[
                    pl.BlockSpec((1, c, hw_tile), lambda i, t: (i, 0, t)),
                    pl.BlockSpec((c_out, c), lambda i, t: (0, 0)),
                    pl.BlockSpec((c_out, 1), lambda i, t: (0, 0)),
                    pl.BlockSpec((c_out, 1), lambda i, t: (0, 0)),
                ],
                out_specs=pl.BlockSpec((1, c_out, 1), lambda i, t: (i, 0, 0)),
                scratch_shapes=[pltpu.VMEM((c_out, 1), jnp.float32)],
                compiler_params=pltpu.CompilerParams(
                    dimension_semantics=("parallel", "arbitrary")
                ),
            )(x3, w_mat, scale, shift)
            return out.reshape(n, c_out, 1, 1)

        # Pure global average pooling: tile C (parallel) and HW (reduction).
        c_tile = _choose_tile(c, 256, 8)
        target_hw = max(128, (8 * 1024 * 1024) // max(1, c_tile * itemsize))
        hw_tile = _choose_tile(hw, target_hw, 128)
        grid = (n, c // c_tile, hw // hw_tile)
        inv_hw = 1.0 / float(hw)

        out = pl.pallas_call(
            functools.partial(_gap_kernel, inv_hw=inv_hw),
            out_shape=jax.ShapeDtypeStruct((n, c, 1), x.dtype),
            grid=grid,
            in_specs=[pl.BlockSpec((1, c_tile, hw_tile), lambda i, j, t: (i, j, t))],
            out_specs=pl.BlockSpec((1, c_tile, 1), lambda i, j, t: (i, j, 0)),
            scratch_shapes=[pltpu.VMEM((c_tile, 1), jnp.float32)],
            compiler_params=pltpu.CompilerParams(
                dimension_semantics=("parallel", "parallel", "arbitrary")
            ),
        )(x3)
        return out.reshape(n, c, 1, 1)


def _reference(module: GlobalAvgPool, x):
    """Plain-JAX reference for correctness check."""
    if module.has_dr:
        y = jnp.einsum("nchw,oc->nohw", x, module.w)
        y = y * module.scale.reshape(1, -1, 1, 1) + module.shift.reshape(1, -1, 1, 1)
        y = jnp.maximum(y, 0.0)
    else:
        y = x
    return jnp.mean(y, axis=(2, 3), keepdims=True)


if __name__ == "__main__":
    key = jax.random.PRNGKey(0)
    # Small shapes: batch=2, channels=16, spatial=8x8, dim_reduction=8
    x = jax.random.normal(key, (2, 16, 8, 8), dtype=jnp.float32)

    # Case 1: with dim-reduction block (1x1 conv + BN + ReLU, then pooling)
    gap_dr = GlobalAvgPool(input_dim=16, dim_reduction=8)
    out_dr = gap_dr(x)
    jax.block_until_ready(out_dr)
    assert out_dr.shape == (2, 8, 1, 1)
    ref_dr = _reference(gap_dr, x)
    assert jnp.allclose(out_dr, ref_dr, atol=1e-5, rtol=1e-5)

    # Case 2: pure global average pooling (dim_reduction=None)
    gap = GlobalAvgPool(input_dim=16, dim_reduction=None)
    out = gap(x)
    jax.block_until_ready(out)
    assert out.shape == (2, 16, 1, 1)
    ref = _reference(gap, x)
    assert jnp.allclose(out, ref, atol=1e-5, rtol=1e-5)

    print("KERNEL_OK")
</pallas_src>

<mosaic_0001>
module attributes {stable_mosaic.version = 11 : i64} {
  func.func @_gap_dr_kernel(%arg0: i32, %arg1: i32, %arg2: memref<1x16x64xf32, #tpu.memory_space<vmem>>, %arg3: memref<8x16xf32, #tpu.memory_space<vmem>>, %arg4: memref<8x1xf32, #tpu.memory_space<vmem>>, %arg5: memref<8x1xf32, #tpu.memory_space<vmem>>, %arg6: memref<1x8x1xf32, #tpu.memory_space<vmem>>, %arg7: memref<8x1xf32, #tpu.memory_space<vmem>>) attributes {dimension_semantics = [#tpu.dimension_semantics<parallel>, #tpu.dimension_semantics<arbitrary>], iteration_bounds = array<i64: 2, 1>, scalar_prefetch = 0 : i64, scratch_operands = 1 : i64, tpu.core_type = #tpu.core_type<tc>, window_params = [{transform_indices = @transform_0, window_bounds = array<i64: 1, 16, 64>}, {pipeline_mode = #tpu.pipeline_mode<synchronous>, transform_indices = @transform_1, window_bounds = array<i64: 8, 16>}, {pipeline_mode = #tpu.pipeline_mode<synchronous>, transform_indices = @transform_2, window_bounds = array<i64: 8, 1>}, {pipeline_mode = #tpu.pipeline_mode<synchronous>, transform_indices = @transform_3, window_bounds = array<i64: 8, 1>}, {transform_indices = @transform_4, window_bounds = array<i64: 1, 8, 1>}]} {
    %c0_i32 = arith.constant 0 : i32
    %0 = arith.cmpi eq, %arg1, %c0_i32 : i32
    %1 = arith.extui %0 : i1 to i32
    %c0_i32_0 = arith.constant 0 : i32
    %2 = arith.cmpi ne, %1, %c0_i32_0 : i32
    scf.if %2 {
      %cst_17 = arith.constant 0.000000e+00 : f32
      %23 = vector.broadcast %cst_17 : f32 to vector<8x1xf32>
      %c0_18 = arith.constant 0 : index
      %c0_19 = arith.constant 0 : index
      %24 = vector.load %arg7[%c0_18, %c0_19] : memref<8x1xf32, #tpu.memory_space<vmem>>, vector<8x1xf32>
      tpu.vector_store %arg7[%c0_18, %c0_19], %23 {strides = array<i32>} : memref<8x1xf32, #tpu.memory_space<vmem>>, vector<8x1xf32>,
    } else {
    }
    %c0 = arith.constant 0 : index
    %c0_1 = arith.constant 0 : index
    %c0_2 = arith.constant 0 : index
    %3 = vector.load %arg2[%c0, %c0_1, %c0_2] : memref<1x16x64xf32, #tpu.memory_space<vmem>>, vector<1x16x64xf32>
    %4 = vector.shape_cast %3 : vector<1x16x64xf32> to vector<16x64xf32>
    %c0_3 = arith.constant 0 : index
    %c0_4 = arith.constant 0 : index
    %5 = vector.load %arg3[%c0_3, %c0_4] : memref<8x16xf32, #tpu.memory_space<vmem>>, vector<8x16xf32>
    %cst = arith.constant dense<0.000000e+00> : vector<8x64xf32>
    %6 = tpu.matmul %5, %4, %cst {dimension_numbers = #tpu.dot_dimension_numbers<[1], [0], [0], [1], [0, 0, 1, 1], [], []>} : vector<8x16xf32>, vector<16x64xf32>, vector<8x64xf32> -> vector<8x64xf32>
    %c0_5 = arith.constant 0 : index
    %c0_6 = arith.constant 0 : index
    %7 = vector.load %arg4[%c0_5, %c0_6] : memref<8x1xf32, #tpu.memory_space<vmem>>, vector<8x1xf32>
    %8 = vector.broadcast %7 : vector<8x1xf32> to vector<8x64xf32>
    %9 = arith.mulf %6, %8 : vector<8x64xf32>
    %c0_7 = arith.constant 0 : index
    %c0_8 = arith.constant 0 : index
    %10 = vector.load %arg5[%c0_7, %c0_8] : memref<8x1xf32, #tpu.memory_space<vmem>>, vector<8x1xf32>
    %11 = vector.broadcast %10 : vector<8x1xf32> to vector<8x64xf32>
    %12 = arith.addf %9, %11 : vector<8x64xf32>
    %cst_9 = arith.constant 0.000000e+00 : f32
    %13 = vector.broadcast %cst_9 : f32 to vector<8x64xf32>
    %14 = arith.maximumf %12, %13 : vector<8x64xf32>
    %c0_10 = arith.constant 0 : index
    %c0_11 = arith.constant 0 : index
    %15 = vector.load %arg7[%c0_10, %c0_11] : memref<8x1xf32, #tpu.memory_space<vmem>>, vector<8x1xf32>
    %cst_12 = arith.constant dense<0.000000e+00> : vector<8xf32>
    %16 = vector.multi_reduction <add>, %14, %cst_12 [1] : vector<8x64xf32> to vector<8xf32>
    %17 = vector.shape_cast %16 : vector<8xf32> to vector<8x1xf32>
    %18 = arith.addf %15, %17 : vector<8x1xf32>
    %c0_13 = arith.constant 0 : index
    %c0_14 = arith.constant 0 : index
    %19 = vector.load %arg7[%c0_13, %c0_14] : memref<8x1xf32, #tpu.memory_space<vmem>>, vector<8x1xf32>
    tpu.vector_store %arg7[%c0_13, %c0_14], %18 {strides = array<i32>} : memref<8x1xf32, #tpu.memory_space<vmem>>, vector<8x1xf32>,
    %c0_i32_15 = arith.constant 0 : i32
    %20 = arith.cmpi eq, %arg1, %c0_i32_15 : i32
    %21 = arith.extui %20 : i1 to i32
    %c0_i32_16 = arith.constant 0 : i32
    %22 = arith.cmpi ne, %21, %c0_i32_16 : i32
    scf.if %22 {
      %c0_17 = arith.constant 0 : index
      %c0_18 = arith.constant 0 : index
      %23 = vector.load %arg7[%c0_17, %c0_18] : memref<8x1xf32, #tpu.memory_space<vmem>>, vector<8x1xf32>
      %c0_19 = arith.constant 0 : index
      %c0_20 = arith.constant 0 : index
      %c0_21 = arith.constant 0 : index
      %24 = vector.load %arg6[%c0_19, %c0_20, %c0_21] : memref<1x8x1xf32, #tpu.memory_space<vmem>>, vector<1x8x1xf32>
      %25 = vector.shape_cast %24 : vector<1x8x1xf32> to vector<8x1xf32>
      %26 = vector.shape_cast %23 : vector<8x1xf32> to vector<1x8x1xf32>
      tpu.vector_store %arg6[%c0_19, %c0_20, %c0_21], %26 {strides = array<i32>} : memref<1x8x1xf32, #tpu.memory_space<vmem>>, vector<1x8x1xf32>,
    } else {
    }
    return
  }
  func.func @transform_0(%arg0: i32, %arg1: i32) -> (i32, i32, i32) {
    %c0_i32 = arith.constant 0 : i32
    %c0_i32_0 = arith.constant 0 : i32
    return %arg0, %c0_i32, %arg1 : i32, i32, i32
  }
  func.func @transform_1(%arg0: i32, %arg1: i32) -> (i32, i32) {
    %c0_i32 = arith.constant 0 : i32
    %c0_i32_0 = arith.constant 0 : i32
    %c0_i32_1 = arith.constant 0 : i32
    return %c0_i32, %c0_i32_0 : i32, i32
  }
  func.func @transform_2(%arg0: i32, %arg1: i32) -> (i32, i32) {
    %c0_i32 = arith.constant 0 : i32
    %c0_i32_0 = arith.constant 0 : i32
    %c0_i32_1 = arith.constant 0 : i32
    return %c0_i32, %c0_i32_0 : i32, i32
  }
  func.func @transform_3(%arg0: i32, %arg1: i32) -> (i32, i32) {
    %c0_i32 = arith.constant 0 : i32
    %c0_i32_0 = arith.constant 0 : i32
    %c0_i32_1 = arith.constant 0 : i32
    return %c0_i32, %c0_i32_0 : i32, i32
  }
  func.func @transform_4(%arg0: i32, %arg1: i32) -> (i32, i32, i32) {
    %c0_i32 = arith.constant 0 : i32
    %c0_i32_0 = arith.constant 0 : i32
    %c0_i32_1 = arith.constant 0 : i32
    return %arg0, %c0_i32, %c0_i32_0 : i32, i32, i32
  }
}

</mosaic_0001>

<bundles_post_ra>
// kernel: tpu_custom_call.1
= control target key start
LH: loop header
LB: loop body
LE: loop exit
PB: predicated region body
PF: predicated region fallthrough
CT: control target
= control target key end

     0   :  { %9 = vsyncpa [#allocation4], 0  ;;  %s721_s0 = inlined_call_operand.hbm [shape: f32[2,16,64], index: 0, kind: input, shape index: {}]   ;;  %s722_s1 = inlined_call_operand.vmem [shape: f32[8,16], index: 1, kind: input, shape index: {}]   ;;  %s723_s2 = inlined_call_operand.vmem [shape: f32[8,1], index: 2, kind: input, shape index: {}]   ;;  %s724_s3 = inlined_call_operand.vmem [shape: f32[8,1], index: 3, kind: input, shape index: {}]   ;;  %s725_s4 = inlined_call_operand.vmem [shape: f32[2,8,1], index: 4, kind: output, shape index: {}]  }
   0x1   :  { %11 = vsyncpa [#allocation4 + $0x1], 0  ;;  %s613_s15 = smov 0   ;;  %s615_s16 = smov 0  }
   0x2   :  { %s617_s17 = smov 0   ;;  %s619_s18 = smov 0  }
   0x3   :  { %s621_s19 = smov 0   ;;  %s623_s20 = smov 0  }
   0x4 LB: > { %s417_s21 = sadd.s32 4294967295, %s580_s20   ;;  %s29_s22 = sadd.s32 1, %s576_s19  ;;  %s580_s20 = sphi %s623_s20, %s17_s20   ;;  %s576_s19 = sphi %s621_s19, %s733_s19   ;;  %s572_s18 = sphi %s619_s18, %s732_s18   ;;  %s568_s17 = sphi %s617_s17, %s731_s17   ;;  %s564_s16 = sphi %s615_s16, %s730_s16   ;;  %s560_s15 = sphi %s613_s15, %s729_s15  }
   0x5   : > { %p31_p0 = scmp.ge.s32.totalorder %s29_s22, 2  ;;  %s38_s23 = sadd.s32 1, %s568_s17 }
   0x6   : > { %p45_p1 = scmp.ne.s32.totalorder %s568_s17, %s564_s16  ;;  %p46_p2 = scmp.eq.s32.totalorder %s580_s20, 0 }
   0x7   : > { %s735_s22 = smov (%p31_p0, %s29_s22), 0  ;;  %p51_p4 = scmp.ne.s32.totalorder %s564_s16, %s560_s15 }
   0x8   : > { %p649_p3 = por %p46_p2, %p45_p1  ;;  %s33_s25 = ssub.s32 %s576_s19, %s735_s22 }
   0x9   : > { %p52_p5 = scmp.eq.s32.totalorder %s417_s21, 0  ;;  %p36_p6 = scmp.eq.s32.totalorder %s33_s25, 0 }
   0xa   : > { %p447_p8 = scmp.lt.s32.totalorder %s580_s20, 2  ;;  %s173_s28 = sand.u32 1, %s568_s17  }
   0xb   : > { %p656_p7 = por %p52_p5, %p51_p4  ;;  %s430_s29 = sshll.u32 %s576_s19, 8 }
   0xc   : > { %s662_s27 = scalar_select %p36_p6, %s568_s17, %s38_s23  }
   0xd   : > { %s421_s30 = sshll.u32 %s173_s28, 4  ;;  %s184_s7 = scalar_lea.hbm %s721_s0, %s430_s29 }
   0xe   : > { %s177_s8 = scalar_lea.vmem [#allocation3], %s421_s30  ;;  %p671_p9 = pnand %p447_p8, %p649_p3 }
   0xf   : > { %s185_s9 = sshll.u32 %s177_s8, 4  ;;  %s174_s11 = scalar_lea.sflag [#allocation4], %s173_s28  ;;  %s186_s9 = int_to_ptr.vmem [resolvable:$true] %s185_s9 }
  0x10   : > { %p504_p10 = pneg %p671_p9  ;;  %s515_s12 = scalar_lea.vmem %s186_s9, 256 }
  0x11   : > { %p516_p11 = scmp.ne.s32.totalorder %s186_s9, %s515_s12  ;;  %s582_s13 = smov [#allocation3]  }
  0x12   : > { %s520_s14 = sshll.u32 %s582_s13, 4  ;;  %s521_s14 = int_to_ptr.vmem [resolvable:$false] %s520_s14 }
  0x13   : > { %p518_p12 = pnand %p516_p11, %p504_p10  ;;  %s522_s15 = scalar_lea.vmem %s521_s14, 512 }
  0x14   : > { %p523_p0 = scmp.lt.s32.totalorder %s186_s9, %s521_s14  ;;  %p524_p1 = scmp.lt.s32.totalorder %s522_s15, %s515_s12 }
  0x15   : > { %p519_p13 = pneg %p518_p12 }
  0x16   : > { %p525_p2 = por %p524_p1, %p523_p0 }
  0x18   : > { %p526_p3 = pnand %p525_p2, %p519_p13 }
  0x1a   : > { %529 = shalt.err (!%p526_p3)
}
  0x1b   : > { %s583_s21 = smov 128   ;;  %s584_s23 = smov 8  }
  0x1c   : > { %446 = dma.hbm_to_vmem [thread:$0]  (!%p671_p9), %s184_s7, 256, %s186_s9, %s174_s11, %s583_s21, %s583_s21, %s584_s23  }
  0x1d   : > { %p424_p4 = scmp.ge.s32.totalorder %s580_s20, 1  ;;  %p193_p5 = scmp.lt.s32.totalorder %s580_s20, 3 }
  0x1f   : > { %p194_p6 = pnand %p424_p4, %p193_p5 }
  0x20   : > { %s199_s24 = sand.u32 (!%p194_p6), 1, %s564_s16  }
  0x21   : > { %197 = sbr.rel (%p194_p6) target bundleno = 393 (0x189), region = 36  ;;  %s425_s25 = sshll.u32 (!%p194_p6), %s199_s24, 4 }
  0x22   : > { %s200_s28 = scalar_lea.sflag (!%p194_p6), [#allocation4], %s199_s24  ;;  %s203_s29 = scalar_lea.vmem (!%p194_p6), [#allocation3], %s425_s25 }
  0x26   : > { %555 = dma.done.wait (%p656_p7), %s200_s28, 256  }
  0x27   : > { %557 = vsyncadd (%p656_p7), %s200_s28, 4294967040  ;;  %vm235_vm0 = vcmask 7168   ;;  %v585_v0 = vmov 0.0   ;;  %vm586_vm1 = vmmov 0   ;;  %v587_v1 = vmov 0   ;;  %v238_v2 = vld [vmem:[%s203_s29 + $0x8] sm:$0xff] }
  0x28   : > { %236 = vst.msk [vmem:[#allocation2] sm:$0xff] %vm235_vm0, %v585_v0  ;;  %434 = vmatprep.subr.mxu0 %v585_v0  ;;  %438 = vmatprep.mubr.msk.f32.mxu0 %vm586_vm1, %v585_v0  ;;  %v237_v3 = vld [vmem:[%s203_s29] sm:$0xff]  ;;  %v239_v4 = vld [vmem:[%s722_s1] sm:$0xff]  ;;  %vm240_vm2 = vcmask 130048   ;;  %vm330_vm3 = vcmask 523264   ;;  %p227_p7 = scmp.lt.s32.totalorder %s572_s18, 1 }
  0x29   : > { %501 = vset.pattern.permute.xlu0 %v587_v1  ;;  %435 = vmatpush3.msra.mxu0 %v238_v2  ;;  %v314_v5 = vld [vmem:[%s723_s2] sm:$0xff] }
  0x2a   : > { %436 = vmatprep.subr.mxu0 %v585_v0  ;;  %317 = vperm.xlu0 %501, %v314_v5   ;;  %v321_v6 = vld [vmem:[%s724_s3] sm:$0xff]  ;;  %s737_s18 = smov (!%p227_p7, %s572_s18), 1 }
  0x2b   : > { %437 = vmatpush3.msra.mxu0 %v237_v3  ;;  %s426_s9 = sshll.u32 %s737_s18, 3 }
  0x2c   : > { %439 = vmatmul.mubr.msk.f32.vlgmr.msra.gmra.mxu0 %vm240_vm2, %v239_v4  ;;  %s230_s12 = scalar_lea.vmem %s725_s4, %s426_s9 }
  0x2e   : > { %324 = vperm.xlu0 %501, %v321_v6  }
  0x2f   : > { %v329_v15 = vld [vmem:[#allocation2] sm:$0xff] }
  0xa5   : > { %v318_v7 = vpop.permute.xlu0 %317 }
  0xa9   : > { %v325_v10 = vpop.permute.xlu0 %324 }
  0xec   : > { %v310_v8 = vpop.f32.mrf.mxu0 }
  0xed   : > { %v320_v9 = vmul.f32 %v318_v7, %v310_v8 }
  0xee   : > { %v440_v11 = vpop.f32.mrf.mxu0 }
  0xef   : > { %v327_v12 = vadd.f32 %v325_v10, %v320_v9 }
  0xf1   : > { %v328_v13 = vmax.f32 %v327_v12, 0.0 }
  0xf3   : > { %v331_v14 = vsel %vm330_vm3, %v328_v13, 0.0 }
  0xf4   : > { %332 = vadd.xlane.f32.xlu1 %v331_v14 }
 0x17d   : > { %v333_v16 = vpop.xlane.xlu1 %332 }
 0x17e   : > { %v334_v17 = vadd.f32 %v333_v16, %v329_v15 }
 0x180   : > { %336 = vst.msk [vmem:[#allocation2] sm:$0xff] %vm235_vm0, %v334_v17 }
 0x187   : > { %v340_v18 = vld [vmem:[#allocation2] sm:$0xff] }
 0x188   : > { %341 = vst.msk [vmem:[%s230_s12] sm:$0xff] %vm235_vm0, %v340_v18 }
 0x189 PF: > { %s17_s20 = sadd.s32 1, %s580_s20   ;;  %s729_s15 = smov %s564_s16 }
 0x18a   : > { %p14_p8 = scmp.ge.s32.totalorder %s17_s20, 4   ;;  %s730_s16 = smov %s568_s17 }
 0x18b   : > { %s731_s17 = smov %s662_s27  ;;  %s732_s18 = smov %s576_s19 }
 0x18c   : > { %s733_s19 = smov %s735_s22  ;;  %16 = sbr.rel (!%p14_p8) target bundleno = 4 (0x4), region = 84 }
 0x191   :  { %361 = vsyncpa [#allocation4], 1 }
 0x192   :  { %363 = vsyncpa [#allocation4 + $0x1], 1 }

</bundles_post_ra>
